<compile_context>
chip_gen: v7x
topology: tpu7x:2x2x1
jax: 0.10.0
libtpu: 0.0.40
codegen_flags: <defaults>
</compile_context>

<pallas_src>
import jax
import jax.numpy as jnp
from jax.experimental import pallas as pl
from jax.experimental.pallas import tpu as pltpu

_SOFTPLUS_THRESHOLD = 20.0            # torch.nn.functional.softplus default
_TARGET_BLOCK_BYTES = 4 * 1024 * 1024  # ~4 MiB per block (x2 in/out, x2 buffers = 16 MiB)


def mish_kernel(x_ref, o_ref):
    # mish(x) = x * tanh(softplus(x)); with e = exp(min(x, 20)), p = e*(e+2):
    #   tanh(log1p(e)) = p / (p + 2)   (and == 1.0f exactly for x >= 20).
    x = x_ref[...].astype(jnp.float32)
    e = jnp.exp(jnp.minimum(x, _SOFTPLUS_THRESHOLD))
    p = e * (e + 2.0)
    o_ref[...] = (x * (p / (p + 2.0))).astype(o_ref.dtype)


def _round_up(v, m):
    return -(-v // m) * m


def _tile_rows(rows, tm_cap, sub):
    """Pick (row-tile tm, grid steps) for a (rows, lanes) slab."""
    if rows < 2 * sub:
        return rows, 1                       # single full-extent block (always legal)
    if rows <= tm_cap:
        # Enough rows for two blocks: split so both v7x TensorCores get work.
        tm = min(_round_up(-(-rows // 2), sub), rows)
    else:
        tm = tm_cap
    return tm, -(-rows // tm)                # partial last block is masked by Pallas


def _run(x2d, dtype, tm, grid, lanes):
    rows = x2d.shape[0]
    itemsize = jnp.dtype(dtype).itemsize
    total = rows * lanes
    return pl.pallas_call(
        mish_kernel,
        out_shape=jax.ShapeDtypeStruct((rows, lanes), dtype),
        grid=(grid,),
        in_specs=[pl.BlockSpec((tm, lanes), lambda i: (i, 0))],
        out_specs=pl.BlockSpec((tm, lanes), lambda i: (i, 0)),
        compiler_params=pltpu.CompilerParams(
            dimension_semantics=("parallel",),      # megacore split on v7x
            vmem_limit_bytes=48 * 1024 * 1024,      # safe on v5e/v6e/v7x
        ),
        cost_estimate=pl.CostEstimate(
            flops=5 * total,
            transcendentals=total,
            bytes_accessed=2 * total * itemsize,
        ),
    )(x2d)


def mish(x):
    """Elementwise Mish for an arbitrarily shaped float array."""
    shape, dtype = x.shape, x.dtype
    n = x.size
    itemsize = jnp.dtype(dtype).itemsize
    sub = max(8, 32 // itemsize)             # sublane packing: f32->8, bf16->16, 1B->32

    # Fast path: widest lane count in {512, 256, 128} dividing n -> pure reshape,
    # no pad, no tail slice (no extra HBM passes around the custom call).
    lanes = next((l for l in (512, 256, 128) if n % l == 0), None)
    if lanes is not None:
        rows = n // lanes
        tm_cap = max(sub, (_TARGET_BLOCK_BYTES // itemsize // lanes) // sub * sub)
        tm, grid = _tile_rows(rows, tm_cap, sub)
        out2d = _run(x.reshape(rows, lanes), dtype, tm, grid, lanes)
        return out2d.reshape(shape)

    # Ragged path: minimal pad of the flat tail to a multiple of 128 lanes,
    # slice it back off afterwards (mish(0) == 0, so padding is harmless).
    lanes = 128
    padded_n = _round_up(n, lanes)
    flat = jnp.pad(x.reshape(-1), (0, padded_n - n))
    rows = padded_n // lanes
    tm_cap = max(sub, (_TARGET_BLOCK_BYTES // itemsize // lanes) // sub * sub)
    tm, grid = _tile_rows(rows, tm_cap, sub)
    out2d = _run(flat.reshape(rows, lanes), dtype, tm, grid, lanes)
    return out2d.reshape(-1)[:n].reshape(shape)


def mish_reference(x):
    xf = x.astype(jnp.float32)
    return (xf * jnp.tanh(jax.nn.softplus(xf))).astype(x.dtype)


if __name__ == "__main__":
    key = jax.random.PRNGKey(0)
    k1, k2, k3 = jax.random.split(key, 3)

    # Primary test: module-consistent small shape (B, C, H, W), fast path, grid=1.
    x = jax.random.normal(k1, (2, 4, 16, 16), jnp.float32) * 5.0
    y = jax.block_until_ready(mish(x))
    y_ref = mish_reference(x)
    assert y.shape == x.shape
    assert bool(jnp.all(jnp.isfinite(y)))
    assert bool(jnp.allclose(y, y_ref, atol=1e-5, rtol=1e-5))

    # Ragged shape: exercises the pad / tail-slice path and the softplus threshold.
    x2 = jax.random.normal(k2, (3, 5, 7), jnp.float32) * 15.0
    y2 = jax.block_until_ready(mish(x2))
    y2_ref = mish_reference(x2)
    assert y2.shape == x2.shape
    assert bool(jnp.all(jnp.isfinite(y2)))
    assert bool(jnp.allclose(y2, y2_ref, atol=1e-5, rtol=1e-5))

    # Multi-block fast path (grid >= 2, both TensorCores on v7x).
    x3 = jax.random.normal(k3, (2, 4, 64, 64), jnp.float32) * 10.0
    y3 = jax.block_until_ready(mish(x3))
    y3_ref = mish_reference(x3)
    assert y3.shape == x3.shape
    assert bool(jnp.all(jnp.isfinite(y3)))
    assert bool(jnp.allclose(y3, y3_ref, atol=1e-5, rtol=1e-5))

    print("KERNEL_OK")
</pallas_src>

<mosaic_0001>
module attributes {stable_mosaic.version = 11 : i64} {
  func.func @mish_kernel(%arg0: i32, %arg1: memref<4x512xf32, #tpu.memory_space<vmem>>, %arg2: memref<4x512xf32, #tpu.memory_space<vmem>>) attributes {dimension_semantics = [#tpu.dimension_semantics<parallel>], iteration_bounds = array<i64: 1>, scalar_prefetch = 0 : i64, scratch_operands = 0 : i64, tpu.core_type = #tpu.core_type<tc>, window_params = [{transform_indices = @transform_0, window_bounds = array<i64: 4, 512>}, {transform_indices = @transform_1, window_bounds = array<i64: 4, 512>}]} {
    %c0 = arith.constant 0 : index
    %c0_0 = arith.constant 0 : index
    %0 = vector.load %arg1[%c0, %c0_0] : memref<4x512xf32, #tpu.memory_space<vmem>>, vector<4x512xf32>
    %cst = arith.constant 2.000000e+01 : f32
    %1 = vector.broadcast %cst : f32 to vector<4x512xf32>
    %2 = arith.minimumf %0, %1 : vector<4x512xf32>
    %3 = math.exp %2 : vector<4x512xf32>
    %cst_1 = arith.constant 2.000000e+00 : f32
    %4 = vector.broadcast %cst_1 : f32 to vector<4x512xf32>
    %5 = arith.addf %3, %4 : vector<4x512xf32>
    %6 = arith.mulf %3, %5 : vector<4x512xf32>
    %cst_2 = arith.constant 2.000000e+00 : f32
    %7 = vector.broadcast %cst_2 : f32 to vector<4x512xf32>
    %8 = arith.addf %6, %7 : vector<4x512xf32>
    %9 = arith.divf %6, %8 : vector<4x512xf32>
    %10 = arith.mulf %0, %9 : vector<4x512xf32>
    %c0_3 = arith.constant 0 : index
    %c0_4 = arith.constant 0 : index
    %11 = vector.load %arg2[%c0_3, %c0_4] : memref<4x512xf32, #tpu.memory_space<vmem>>, vector<4x512xf32>
    tpu.vector_store %arg2[%c0_3, %c0_4], %10 {strides = array<i32>} : memref<4x512xf32, #tpu.memory_space<vmem>>, vector<4x512xf32>,
    return
  }
  func.func @transform_0(%arg0: i32) -> (i32, i32) {
    %c0_i32 = arith.constant 0 : i32
    %c0_i32_0 = arith.constant 0 : i32
    return %arg0, %c0_i32 : i32, i32
  }
  func.func @transform_1(%arg0: i32) -> (i32, i32) {
    %c0_i32 = arith.constant 0 : i32
    %c0_i32_0 = arith.constant 0 : i32
    return %arg0, %c0_i32 : i32, i32
  }
}

</mosaic_0001>

<bundles_post_ra>
// kernel: tpu_custom_call.1
= control target key start
LH: loop header
LB: loop body
LE: loop exit
PB: predicated region body
PF: predicated region fallthrough
CT: control target
= control target key end

     0   :  { %6 = vsyncpa [#allocation3], 0  ;;  %s152_s0 = inlined_call_operand.hbm [shape: f32[4,512], index: 0, kind: input, shape index: {}]   ;;  %s153_s1 = inlined_call_operand.hbm [shape: f32[4,512], index: 1, kind: output, shape index: {}]  }
   0x1   :  { %7 = vsyncpa [#allocation4], 0  ;;  %s116_s6 = smov [#allocation2]   ;;  %s68_s10 = scalar_lea.hbm %s152_s0, 256 }
   0x2   :  { %s14_s7 = sshll.u32 %s116_s6, 4  ;;  %p69_p0 = scmp.ne.s32.totalorder %s152_s0, %s68_s10  ;;  %s15_s7 = int_to_ptr.vmem [resolvable:$true] %s14_s7 }
   0x3   :  { %p72_p1 = scmp.lt.u32.totalorder %s68_s10, %s152_s0 }
   0x5   :  { %p74_p2 = pnand %p72_p1, %p69_p0 }
   0x7   :  { %77 = shalt.err (!%p74_p2)
}
   0x8   :  { %s78_s15 = scalar_lea.vmem %s15_s7, 256  ;;  %p83_p4 = scmp.lt.s32.totalorder %s15_s7, %s15_s7 }
   0x9   :  { %p79_p3 = scmp.ne.s32.totalorder %s15_s7, %s78_s15  ;;  %p84_p5 = scmp.lt.s32.totalorder %s78_s15, %s78_s15 }
   0xb   :  { %p85_p6 = por %p84_p5, %p83_p4 }
   0xd   :  { %p86_p7 = pnand %p85_p6, %p79_p3 }
   0xf   :  { %89 = shalt.err (!%p86_p7)
}
  0x10   :  { %17 = dma.hbm_to_vmem [thread:$0]  %s152_s0, 256, %s15_s7, [#allocation3]  }
  0x11   :  { %112 = dma.done.wait [#allocation3], 256  }
  0x12   :  { %113 = vsyncadd [#allocation3], 4294967040  ;;  %v21_v0 = vld [vmem:[#allocation2] sm:$0xff]  ;;  %v22_v1 = vld [vmem:[#allocation2 + $0x8] sm:$0xff]  ;;  %s117_s0 = smov [#allocation5]  }
  0x13   :  { %v23_v2 = vmin.f32 %v21_v0, 20.0  ;;  %v24_v3 = vmin.f32 %v22_v1, 20.0  ;;  %s49_s18 = sshll.u32 %s117_s0, 4  ;;  %s50_s18 = int_to_ptr.vmem [resolvable:$true] %s49_s18 }
  0x14   :  { %s90_s19 = scalar_lea.vmem %s50_s18, 256  ;;  %p95_p9 = scmp.lt.s32.totalorder %s50_s18, %s50_s18 }
  0x15   :  { %v25_v4 = vmul.f32 1.442695, %v23_v2  ;;  %v27_v5 = vmul.f32 1.442695, %v24_v3  ;;  %p91_p8 = scmp.ne.s32.totalorder %s50_s18, %s90_s19  ;;  %p96_p10 = scmp.lt.s32.totalorder %s90_s19, %s90_s19 }
  0x17   :  { %60 = vpow2.f32 %v25_v4  ;;  %p97_p11 = por %p96_p10, %p95_p9 }
  0x18   :  { %62 = vpow2.f32 %v27_v5 }
  0x19   :  { %p98_p12 = pnand %p97_p11, %p91_p8 }
  0x21   :  { %v61_v6 = vpop.eup %60 }
  0x22   :  { %v63_v7 = vpop.eup %62  ;;  %v29_v8 = vadd.f32 2.0, %v61_v6 }
  0x23   :  { %v30_v9 = vadd.f32 2.0, %v63_v7 }
  0x24   :  { %v31_v10 = vmul.f32 %v61_v6, %v29_v8 }
  0x25   :  { %v32_v11 = vmul.f32 %v63_v7, %v30_v9 }
  0x26   :  { %v33_v12 = vadd.f32 2.0, %v31_v10 }
  0x27   :  { %v34_v13 = vadd.f32 2.0, %v32_v11 }
  0x28   :  { %64 = vrcp.f32 %v33_v12 }
  0x29   :  { %66 = vrcp.f32 %v34_v13 }
  0x32   :  { %v65_v14 = vpop.eup %64 }
  0x33   :  { %v67_v15 = vpop.eup %66  ;;  %v36_v16 = vmul.f32 %v65_v14, %v31_v10 }
  0x34   :  { %v38_v17 = vmul.f32 %v67_v15, %v32_v11 }
  0x35   :  { %v39_v18 = vmul.f32 %v36_v16, %v21_v0 }
  0x36   :  { %v40_v19 = vmul.f32 %v38_v17, %v22_v1 }
  0x37   :  { %41 = vst [vmem:[#allocation5] sm:$0xff] %v39_v18 }
  0x38   :  { %42 = vst [vmem:[#allocation5 + $0x8] sm:$0xff] %v40_v19 }
  0x39   :  { %101 = shalt.err (!%p98_p12)
}
  0x3a   :  { %s102_s22 = scalar_lea.hbm %s153_s1, 256 }
  0x3b   :  { %p103_p13 = scmp.ne.s32.totalorder %s153_s1, %s102_s22  ;;  %p106_p0 = scmp.lt.u32.totalorder %s102_s22, %s153_s1 }
  0x3d   :  { %p108_p1 = pnand %p106_p0, %p103_p13 }
  0x3f   :  { %111 = shalt.err (!%p108_p1)
}
  0x40   :  { %52 = dma.vmem_to_hbm [thread:$0]  %s50_s18, 256, %s153_s1, [#allocation4]  }
  0x41   :  { %114 = dma.done.wait [#allocation4], 256  }
  0x42   :  { %115 = vsyncadd [#allocation4], 4294967040 }
  0x43   :  { %56 = vsyncpa [#allocation3], 1 }
  0x44   :  { %57 = vsyncpa [#allocation4], 1 }

</bundles_post_ra>
